<compile_context>
chip_gen: v7x
topology: tpu7x:2x2x1
jax: 0.10.0
libtpu: 0.0.40
codegen_flags: <defaults>
</compile_context>

<pallas_src>
import math
import functools

import jax
import jax.numpy as jnp
from jax import lax
from jax.experimental import pallas as pl
from jax.experimental.pallas import tpu as pltpu

_NEG = -3e38                      # finite floor -> NaN-free softmax
_LOG2E = 1.4426950408889634       # log2(e)


# ---------------------------------------------------------------------------
# helpers
# ---------------------------------------------------------------------------

def _round_up(x, m):
    return ((x + m - 1) // m) * m


def _safe_inv(l):
    """Reciprocal of the softmax denominator, NaN-safe for empty rows."""
    l_safe = jnp.where(l == 0.0, 1.0, l)
    inv = pl.reciprocal(l_safe, approx=True)       # EUP slot, nearly free
    return inv * (2.0 - l_safe * inv)              # one Newton step


def _vmem_budget_bytes():
    """Usable per-kernel VMEM budget; conservative default = v7x (64 MiB)."""
    cap = 64 * 1024 * 1024
    try:
        info = pltpu.get_tpu_info()
        cap = int(getattr(info, "vmem_capacity_bytes", cap))
    except Exception:
        pass
    return int(cap * 0.75)         # headroom for compiler temporaries / spills


def _prep_biases(mask, E, H, N, N_pad):
    """Mask and E as separate 4-D arrays at natural broadcast rank (no blow-up)."""
    biases = []
    if mask is not None:
        m = jnp.asarray(mask)
        if not jnp.issubdtype(m.dtype, jnp.floating):
            # TODO(synk): boolean-mask variant (True -> -inf) not wired up.
            raise NotImplementedError("only additive float masks are supported")
        if m.ndim == 2:
            m = m[None, None]
        elif m.ndim == 3:
            m = m[:, None]
        elif m.ndim != 4:
            raise ValueError("mask.dim must be 2, 3, or 4")
        if m.ndim == 4 and m.shape[1] not in (1, H):
            raise ValueError(f"4-D mask head dim must be 1 or {H}")
        biases.append(m)
    if E is not None:
        e = jnp.asarray(E)
        if not jnp.issubdtype(e.dtype, jnp.floating):
            e = e.astype(jnp.float32)
        if e.ndim == 2:
            e = e[None, None]
        elif e.ndim != 4:
            raise ValueError("E must have dim 2 or 4")
        biases.append(e)
    if N_pad != N:
        biases = [jnp.pad(b, ((0, 0), (0, 0), (0, N_pad - N), (0, N_pad - N)))
                  for b in biases]
    return biases


# ---------------------------------------------------------------------------
# kernel bodies
# ---------------------------------------------------------------------------

def _flash_kernel(q_ref, k_ref, v_ref, *rest, scale_log2e, n_valid, n_pad, tk,
                  kv_resident, n_bias):
    """Online-softmax (base-2) step for one (bh, q-tile, kv-tile) grid point."""
    bias_refs = rest[:n_bias]
    o_ref = rest[n_bias]
    m_sc, l_sc, acc_sc = rest[n_bias + 1:n_bias + 4]

    ki = pl.program_id(2)

    @pl.when(ki == 0)
    def _():
        m_sc[...] = jnp.full_like(m_sc, _NEG)
        l_sc[...] = jnp.zeros_like(l_sc)
        acc_sc[...] = jnp.zeros_like(acc_sc)

    # scale*log2(e) folded into q -> bare exp2 softmax, native-dtype MXU operands
    q = q_ref[0] * jnp.asarray(scale_log2e, q_ref.dtype)            # (tq, D)
    if kv_resident:
        start = pl.multiple_of(ki * tk, tk)
        k = k_ref[0, pl.ds(start, tk), :]                           # (tk, D)
        v = v_ref[0, pl.ds(start, tk), :]
    else:
        k = k_ref[0]
        v = v_ref[0]

    s = lax.dot_general(q, k, (((1,), (1,)), ((), ())),
                        preferred_element_type=jnp.float32)         # (tq, tk)
    for b_ref in bias_refs:
        s = s + b_ref[0, 0].astype(jnp.float32) * _LOG2E
    if n_bias:
        s = jnp.maximum(s, _NEG)        # guard user -inf masks (NaN-safe)
    if n_pad != n_valid:
        pos = ki * tk + lax.broadcasted_iota(jnp.int32, s.shape, 1)
        s = jnp.where(pos < n_valid, s, _NEG)

    m_prev = m_sc[...]
    m_new = jnp.maximum(m_prev, jnp.max(s, axis=-1, keepdims=True))
    alpha = jnp.exp2(m_prev - m_new)
    p = jnp.exp2(s - m_new)
    l_sc[...] = alpha * l_sc[...] + jnp.sum(p, axis=-1, keepdims=True)
    acc_sc[...] = alpha * acc_sc[...] + jnp.dot(
        p.astype(v.dtype), v, preferred_element_type=jnp.float32)
    m_sc[...] = m_new

    @pl.when(ki == pl.num_programs(2) - 1)
    def _():
        o_ref[0] = (acc_sc[...] * _safe_inv(l_sc[...])).astype(o_ref.dtype)


def _weights_kernel(q_ref, k_ref, v_ref, *rest, scale_log2e, n_valid, n_pad, n_bias):
    """Exact softmax over the full kv row for one (bh, q-tile); writes weights."""
    bias_refs = rest[:n_bias]
    o_ref = rest[n_bias]
    w_ref = rest[n_bias + 1]

    q = q_ref[0] * jnp.asarray(scale_log2e, q_ref.dtype)            # (tq, D)
    k = k_ref[0]                                                    # (N_pad, D)
    s = lax.dot_general(q, k, (((1,), (1,)), ((), ())),
                        preferred_element_type=jnp.float32)         # (tq, N_pad)
    for b_ref in bias_refs:
        s = s + b_ref[0, 0].astype(jnp.float32) * _LOG2E
    if n_bias:
        s = jnp.maximum(s, _NEG)
    if n_pad != n_valid:
        pos = lax.broadcasted_iota(jnp.int32, s.shape, 1)
        s = jnp.where(pos < n_valid, s, _NEG)

    m = jnp.max(s, axis=-1, keepdims=True)
    p = jnp.exp2(s - m)
    l = jnp.sum(p, axis=-1, keepdims=True)
    w = p * _safe_inv(l)
    o_ref[0] = jnp.dot(w.astype(v_ref.dtype), v_ref[0],
                       preferred_element_type=jnp.float32).astype(o_ref.dtype)
    w_ref[0] = w.astype(w_ref.dtype)


# ---------------------------------------------------------------------------
# wrapper
# ---------------------------------------------------------------------------

def sdp_attn(Q, K, V, mask=None, E=None, dropout_p=0.0, return_attn_weights=False):
    """Pallas port of SDPAttn.forward (eval mode, additive float mask only)."""
    assert Q.shape == K.shape == V.shape, "Q, K, V must have the same shape"
    B, H, N, D = Q.shape
    assert dropout_p == 0.0  # TODO(synk): in-kernel dropout via pltpu.prng_*

    scale_log2e = _LOG2E / math.sqrt(D)
    itemsize = jnp.dtype(Q.dtype).itemsize
    BH = B * H
    budget = _vmem_budget_bytes()

    # --- tile / pad choice: multiples of 128/256 once N >= 128 (MXU-friendly) ---
    if N >= 256:
        tile = 256
    elif N >= 128:
        tile = 128
    else:
        tile = _round_up(N, 8)
    N_pad = _round_up(N, tile)

    def _pad_seq(x):
        if N_pad == N:
            return x
        return jnp.pad(x, ((0, 0), (0, 0), (0, N_pad - N), (0, 0)))

    qf = _pad_seq(Q).reshape(BH, N_pad, D)
    kf = _pad_seq(K).reshape(BH, N_pad, D)
    vf = _pad_seq(V).reshape(BH, N_pad, D)

    biases = _prep_biases(mask, E, H, N, N_pad)
    n_bias = len(biases)

    def _bias_spec(b, tq, tk_blk, has_kv_axis):
        Bb, Hb = b.shape[0], b.shape[1]
        if has_kv_axis:
            def imap(i, qi, ki):
                return ((i // H) if Bb > 1 else 0,
                        (i % H) if Hb > 1 else 0, qi, ki)
        else:
            def imap(i, qi):
                return ((i // H) if Bb > 1 else 0,
                        (i % H) if Hb > 1 else 0, qi, 0)
        return pl.BlockSpec((1, 1, tq, tk_blk), imap)

    bias_traffic = sum(BH * N_pad * N_pad * b.dtype.itemsize for b in biases)

    if not return_attn_weights:
        # ---------------- flash path: no (N,N) materialisation ----------------
        tq = tk = min(tile, N_pad)
        nq, nk = N_pad // tq, N_pad // tk

        # VMEM budgeting: keep K/V resident per bh when the working set fits.
        resident_kv_bytes = 2 * 2 * N_pad * D * itemsize        # K+V double-buffered
        per_step_bytes = (2 * 2 * tq * D * itemsize                       # Q + O
                          + sum(2 * tq * tk * b.dtype.itemsize for b in biases)
                          + (2 * tq + tq * D) * 4)                        # scratch
        kv_resident = (resident_kv_bytes + per_step_bytes) <= budget
        if kv_resident:
            kv_spec = pl.BlockSpec((1, N_pad, D), lambda i, qi, ki: (i, 0, 0))
        else:  # graceful fallback: per-tile streaming (re-DMA across q tiles)
            kv_spec = pl.BlockSpec((1, tk, D), lambda i, qi, ki: (i, ki, 0))

        q_spec = pl.BlockSpec((1, tq, D), lambda i, qi, ki: (i, qi, 0))
        o_spec = pl.BlockSpec((1, tq, D), lambda i, qi, ki: (i, qi, 0))

        kv_read = BH * N_pad * D * itemsize * (1 if kv_resident else nq)
        cost = pl.CostEstimate(
            flops=4 * BH * N_pad * N_pad * D,
            transcendentals=BH * N_pad * N_pad,
            bytes_accessed=2 * BH * N_pad * D * itemsize + 2 * kv_read + bias_traffic)

        kernel = functools.partial(
            _flash_kernel, scale_log2e=scale_log2e, n_valid=N, n_pad=N_pad,
            tk=tk, kv_resident=kv_resident, n_bias=n_bias)

        out = pl.pallas_call(
            kernel,
            out_shape=jax.ShapeDtypeStruct((BH, N_pad, D), Q.dtype),
            grid_spec=pltpu.PrefetchScalarGridSpec(
                num_scalar_prefetch=0,
                grid=(BH, nq, nk),
                in_specs=[q_spec, kv_spec, kv_spec]
                         + [_bias_spec(b, tq, tk, True) for b in biases],
                out_specs=o_spec,
                scratch_shapes=[pltpu.VMEM((tq, 1), jnp.float32),
                                pltpu.VMEM((tq, 1), jnp.float32),
                                pltpu.VMEM((tq, D), jnp.float32)]),
            compiler_params=pltpu.CompilerParams(
                dimension_semantics=("parallel", "parallel", "arbitrary"),
                vmem_limit_bytes=budget),
            cost_estimate=cost,
        )(qf, kf, vf, *biases)

        if N_pad != N:
            out = out[:, :N, :]
        return out.reshape(B, H, N, D)

    # ---------------- weights path: exact softmax, writes O and W ----------------
    kv_bytes = 2 * 2 * N_pad * D * itemsize          # resident K+V, double-buffered
    if N_pad >= 128:
        cands = [c for c in (256, 128, 64, 32, 16, 8) if c <= N_pad and N_pad % c == 0]
    else:
        cands = [N_pad]
    tq = cands[-1]
    for c in cands:
        step_bytes = (2 * 2 * c * D * itemsize                       # Q + O
                      + 2 * c * N_pad * itemsize                     # W block
                      + sum(2 * c * N_pad * b.dtype.itemsize for b in biases)
                      + 3 * c * N_pad * 4)                           # f32 s/p/w temps
        if kv_bytes + step_bytes <= budget:
            tq = c
            break
    nq = N_pad // tq

    q_spec = pl.BlockSpec((1, tq, D), lambda i, qi: (i, qi, 0))
    kv_spec = pl.BlockSpec((1, N_pad, D), lambda i, qi: (i, 0, 0))   # resident per bh
    o_spec = pl.BlockSpec((1, tq, D), lambda i, qi: (i, qi, 0))
    w_spec = pl.BlockSpec((1, tq, N_pad), lambda i, qi: (i, qi, 0))

    cost = pl.CostEstimate(
        flops=4 * BH * N_pad * N_pad * D,
        transcendentals=BH * N_pad * N_pad,
        bytes_accessed=(4 * BH * N_pad * D * itemsize
                        + BH * N_pad * N_pad * itemsize + bias_traffic))

    kernel = functools.partial(_weights_kernel, scale_log2e=scale_log2e,
                               n_valid=N, n_pad=N_pad, n_bias=n_bias)

    out, w = pl.pallas_call(
        kernel,
        out_shape=(jax.ShapeDtypeStruct((BH, N_pad, D), Q.dtype),
                   jax.ShapeDtypeStruct((BH, N_pad, N_pad), Q.dtype)),
        grid_spec=pltpu.PrefetchScalarGridSpec(
            num_scalar_prefetch=0,
            grid=(BH, nq),
            in_specs=[q_spec, kv_spec, kv_spec]
                     + [_bias_spec(b, tq, N_pad, False) for b in biases],
            out_specs=[o_spec, w_spec]),
        compiler_params=pltpu.CompilerParams(
            dimension_semantics=("parallel", "parallel"),
            vmem_limit_bytes=budget),
        cost_estimate=cost,
    )(qf, kf, vf, *biases)

    if N_pad != N:
        out = out[:, :N, :]
        w = w[:, :N, :N]
    return out.reshape(B, H, N, D), w.reshape(B, H, N, N)


# ---------------------------------------------------------------------------
# reference + self-test
# ---------------------------------------------------------------------------

def _reference(Q, K, V, bias=None):
    D = Q.shape[-1]
    s = jnp.einsum("bhnd,bhmd->bhnm", Q, K).astype(jnp.float32) / math.sqrt(D)
    if bias is not None:
        s = s + bias
    w = jax.nn.softmax(s, axis=-1)
    o = jnp.einsum("bhnm,bhmd->bhnd", w, V.astype(jnp.float32))
    return o.astype(Q.dtype), w


def _check(a, b, tag, atol=2e-3, rtol=2e-3):
    if not jnp.allclose(a, b, atol=atol, rtol=rtol):
        raise AssertionError(f"{tag}: max abs err = {jnp.max(jnp.abs(a - b))}")


if __name__ == "__main__":
    key = jax.random.PRNGKey(0)

    # ---- case A: small shapes (B=2, H=4, N=8, D=32), all three paths ----
    B, H, N, D = 2, 4, 8, 32
    kq, kk, kv, ke, km = jax.random.split(key, 5)
    Q = jax.random.normal(kq, (B, H, N, D), dtype=jnp.float32)
    K = jax.random.normal(kk, (B, H, N, D), dtype=jnp.float32)
    V = jax.random.normal(kv, (B, H, N, D), dtype=jnp.float32)
    E = jax.random.normal(ke, (N, N), dtype=jnp.float32) * 0.1
    mask = jax.random.normal(km, (B, 1, N, N), dtype=jnp.float32) * 0.1

    out = jax.block_until_ready(sdp_attn(Q, K, V))
    ref_out, _ = _reference(Q, K, V)
    _check(out, ref_out, "A/flash")

    out_m = jax.block_until_ready(sdp_attn(Q, K, V, mask=mask))
    ref_out_m, _ = _reference(Q, K, V, bias=mask)
    _check(out_m, ref_out_m, "A/flash+mask")

    out2, w2 = sdp_attn(Q, K, V, E=E, return_attn_weights=True)
    out2 = jax.block_until_ready(out2)
    w2 = jax.block_until_ready(w2)
    ref_out2, ref_w2 = _reference(Q, K, V, bias=E[None, None])
    _check(out2, ref_out2, "A/weights out")
    _check(w2, ref_w2, "A/weights w")

    # ---- case B: non-multiple N (padding + tiling + both biases) ----
    B, H, N, D = 1, 2, 200, 64
    kq, kk, kv, ke, km = jax.random.split(jax.random.PRNGKey(1), 5)
    Q = jax.random.normal(kq, (B, H, N, D), dtype=jnp.float32)
    K = jax.random.normal(kk, (B, H, N, D), dtype=jnp.float32)
    V = jax.random.normal(kv, (B, H, N, D), dtype=jnp.float32)
    E = jax.random.normal(ke, (N, N), dtype=jnp.float32) * 0.1
    mask3 = jax.random.normal(km, (B, N, N), dtype=jnp.float32) * 0.1   # 3-D mask
    bias_ref = mask3[:, None] + E[None, None]

    out_b = jax.block_until_ready(sdp_attn(Q, K, V, mask=mask3, E=E))
    ref_out_b, _ = _reference(Q, K, V, bias=bias_ref)
    _check(out_b, ref_out_b, "B/flash+mask+E")

    out_bw, w_bw = sdp_attn(Q, K, V, mask=mask3, E=E, return_attn_weights=True)
    out_bw = jax.block_until_ready(out_bw)
    w_bw = jax.block_until_ready(w_bw)
    ref_out_bw, ref_w_bw = _reference(Q, K, V, bias=bias_ref)
    _check(out_bw, ref_out_bw, "B/weights out")
    _check(w_bw, ref_w_bw, "B/weights w")

    print("KERNEL_OK")
</pallas_src>

<mosaic_0001>
module attributes {stable_mosaic.version = 11 : i64} {
  func.func @_flash_kernel(%arg0: i32, %arg1: i32, %arg2: i32, %arg3: memref<1x8x32xf32, #tpu.memory_space<vmem>>, %arg4: memref<1x8x32xf32, #tpu.memory_space<vmem>>, %arg5: memref<1x8x32xf32, #tpu.memory_space<vmem>>, %arg6: memref<1x8x32xf32, #tpu.memory_space<vmem>>, %arg7: memref<8x1xf32, #tpu.memory_space<vmem>>, %arg8: memref<8x1xf32, #tpu.memory_space<vmem>>, %arg9: memref<8x32xf32, #tpu.memory_space<vmem>>) attributes {dimension_semantics = [#tpu.dimension_semantics<parallel>, #tpu.dimension_semantics<parallel>, #tpu.dimension_semantics<arbitrary>], iteration_bounds = array<i64: 8, 1, 1>, scalar_prefetch = 0 : i64, scratch_operands = 3 : i64, tpu.core_type = #tpu.core_type<tc>, window_params = [{transform_indices = @transform_0, window_bounds = array<i64: 1, 8, 32>}, {transform_indices = @transform_1, window_bounds = array<i64: 1, 8, 32>}, {transform_indices = @transform_2, window_bounds = array<i64: 1, 8, 32>}, {transform_indices = @transform_3, window_bounds = array<i64: 1, 8, 32>}]} {
    %c0_i32 = arith.constant 0 : i32
    %0 = arith.cmpi eq, %arg2, %c0_i32 : i32
    %1 = arith.extui %0 : i1 to i32
    %c0_i32_0 = arith.constant 0 : i32
    %2 = arith.cmpi ne, %1, %c0_i32_0 : i32
    scf.if %2 {
      %cst_25 = arith.constant -3.000000e+38 : f32
      %41 = vector.broadcast %cst_25 : f32 to vector<8x1xf32>
      %c0_26 = arith.constant 0 : index
      %c0_27 = arith.constant 0 : index
      %42 = vector.load %arg7[%c0_26, %c0_27] : memref<8x1xf32, #tpu.memory_space<vmem>>, vector<8x1xf32>
      tpu.vector_store %arg7[%c0_26, %c0_27], %41 {strides = array<i32>} : memref<8x1xf32, #tpu.memory_space<vmem>>, vector<8x1xf32>,
      %cst_28 = arith.constant 0.000000e+00 : f32
      %43 = vector.broadcast %cst_28 : f32 to vector<8x1xf32>
      %c0_29 = arith.constant 0 : index
      %c0_30 = arith.constant 0 : index
      %44 = vector.load %arg8[%c0_29, %c0_30] : memref<8x1xf32, #tpu.memory_space<vmem>>, vector<8x1xf32>
      tpu.vector_store %arg8[%c0_29, %c0_30], %43 {strides = array<i32>} : memref<8x1xf32, #tpu.memory_space<vmem>>, vector<8x1xf32>,
      %cst_31 = arith.constant 0.000000e+00 : f32
      %45 = vector.broadcast %cst_31 : f32 to vector<8x32xf32>
      %c0_32 = arith.constant 0 : index
      %c0_33 = arith.constant 0 : index
      %46 = vector.load %arg9[%c0_32, %c0_33] : memref<8x32xf32, #tpu.memory_space<vmem>>, vector<8x32xf32>
      tpu.vector_store %arg9[%c0_32, %c0_33], %45 {strides = array<i32>} : memref<8x32xf32, #tpu.memory_space<vmem>>, vector<8x32xf32>,
    } else {
    }
    %c0 = arith.constant 0 : index
    %c0_1 = arith.constant 0 : index
    %c0_2 = arith.constant 0 : index
    %3 = vector.load %arg3[%c0, %c0_1, %c0_2] : memref<1x8x32xf32, #tpu.memory_space<vmem>>, vector<1x8x32xf32>
    %4 = vector.shape_cast %3 : vector<1x8x32xf32> to vector<8x32xf32>
    %cst = arith.constant 0.255034864 : f32
    %5 = vector.broadcast %cst : f32 to vector<8x32xf32>
    %6 = arith.mulf %4, %5 : vector<8x32xf32>
    %c8_i32 = arith.constant 8 : i32
    %7 = arith.muli %arg2, %c8_i32 : i32
    %8 = tpu.assume_multiple %7, 8 : i32
    %c0_3 = arith.constant 0 : index
    %9 = arith.index_cast %8 : i32 to index
    %c0_4 = arith.constant 0 : index
    %10 = vector.load %arg4[%c0_3, %9, %c0_4] : memref<1x8x32xf32, #tpu.memory_space<vmem>>, vector<1x8x32xf32>
    %11 = vector.shape_cast %10 : vector<1x8x32xf32> to vector<8x32xf32>
    %c0_5 = arith.constant 0 : index
    %12 = arith.index_cast %8 : i32 to index
    %c0_6 = arith.constant 0 : index
    %13 = vector.load %arg5[%c0_5, %12, %c0_6] : memref<1x8x32xf32, #tpu.memory_space<vmem>>, vector<1x8x32xf32>
    %14 = vector.shape_cast %13 : vector<1x8x32xf32> to vector<8x32xf32>
    %cst_7 = arith.constant dense<0.000000e+00> : vector<8x8xf32>
    %15 = tpu.matmul %6, %11, %cst_7 {dimension_numbers = #tpu.dot_dimension_numbers<[1], [1], [0], [0], [0, 0, 1, 0], [], []>} : vector<8x32xf32>, vector<8x32xf32>, vector<8x8xf32> -> vector<8x8xf32>
    %c0_8 = arith.constant 0 : index
    %c0_9 = arith.constant 0 : index
    %16 = vector.load %arg7[%c0_8, %c0_9] : memref<8x1xf32, #tpu.memory_space<vmem>>, vector<8x1xf32>
    %cst_10 = arith.constant dense<0xFF800000> : vector<8xf32>
    %17 = vector.multi_reduction <maximumf>, %15, %cst_10 [1] : vector<8x8xf32> to vector<8xf32>
    %18 = vector.shape_cast %17 : vector<8xf32> to vector<8x1xf32>
    %19 = arith.maximumf %16, %18 : vector<8x1xf32>
    %20 = arith.subf %16, %19 : vector<8x1xf32>
    %21 = math.exp2 %20 : vector<8x1xf32>
    %22 = vector.broadcast %19 : vector<8x1xf32> to vector<8x8xf32>
    %23 = arith.subf %15, %22 : vector<8x8xf32>
    %24 = math.exp2 %23 : vector<8x8xf32>
    %c0_11 = arith.constant 0 : index
    %c0_12 = arith.constant 0 : index
    %25 = vector.load %arg8[%c0_11, %c0_12] : memref<8x1xf32, #tpu.memory_space<vmem>>, vector<8x1xf32>
    %26 = arith.mulf %21, %25 : vector<8x1xf32>
    %cst_13 = arith.constant dense<0.000000e+00> : vector<8xf32>
    %27 = vector.multi_reduction <add>, %24, %cst_13 [1] : vector<8x8xf32> to vector<8xf32>
    %28 = vector.shape_cast %27 : vector<8xf32> to vector<8x1xf32>
    %29 = arith.addf %26, %28 : vector<8x1xf32>
    %c0_14 = arith.constant 0 : index
    %c0_15 = arith.constant 0 : index
    %30 = vector.load %arg8[%c0_14, %c0_15] : memref<8x1xf32, #tpu.memory_space<vmem>>, vector<8x1xf32>
    tpu.vector_store %arg8[%c0_14, %c0_15], %29 {strides = array<i32>} : memref<8x1xf32, #tpu.memory_space<vmem>>, vector<8x1xf32>,
    %c0_16 = arith.constant 0 : index
    %c0_17 = arith.constant 0 : index
    %31 = vector.load %arg9[%c0_16, %c0_17] : memref<8x32xf32, #tpu.memory_space<vmem>>, vector<8x32xf32>
    %32 = vector.broadcast %21 : vector<8x1xf32> to vector<8x32xf32>
    %33 = arith.mulf %32, %31 : vector<8x32xf32>
    %cst_18 = arith.constant dense<0.000000e+00> : vector<8x32xf32>
    %34 = tpu.matmul %24, %14, %cst_18 {dimension_numbers = #tpu.dot_dimension_numbers<[1], [0], [0], [1], [0, 0, 1, 1], [], []>} : vector<8x8xf32>, vector<8x32xf32>, vector<8x32xf32> -> vector<8x32xf32>
    %35 = arith.addf %33, %34 : vector<8x32xf32>
    %c0_19 = arith.constant 0 : index
    %c0_20 = arith.constant 0 : index
    %36 = vector.load %arg9[%c0_19, %c0_20] : memref<8x32xf32, #tpu.memory_space<vmem>>, vector<8x32xf32>
    tpu.vector_store %arg9[%c0_19, %c0_20], %35 {strides = array<i32>} : memref<8x32xf32, #tpu.memory_space<vmem>>, vector<8x32xf32>,
    %c0_21 = arith.constant 0 : index
    %c0_22 = arith.constant 0 : index
    %37 = vector.load %arg7[%c0_21, %c0_22] : memref<8x1xf32, #tpu.memory_space<vmem>>, vector<8x1xf32>
    tpu.vector_store %arg7[%c0_21, %c0_22], %19 {strides = array<i32>} : memref<8x1xf32, #tpu.memory_space<vmem>>, vector<8x1xf32>,
    %c0_i32_23 = arith.constant 0 : i32
    %38 = arith.cmpi eq, %arg2, %c0_i32_23 : i32
    %39 = arith.extui %38 : i1 to i32
    %c0_i32_24 = arith.constant 0 : i32
    %40 = arith.cmpi ne, %39, %c0_i32_24 : i32
    scf.if %40 {
      %c0_25 = arith.constant 0 : index
      %c0_26 = arith.constant 0 : index
      %41 = vector.load %arg9[%c0_25, %c0_26] : memref<8x32xf32, #tpu.memory_space<vmem>>, vector<8x32xf32>
      %c0_27 = arith.constant 0 : index
      %c0_28 = arith.constant 0 : index
      %42 = vector.load %arg8[%c0_27, %c0_28] : memref<8x1xf32, #tpu.memory_space<vmem>>, vector<8x1xf32>
      %cst_29 = arith.constant 0.000000e+00 : f32
      %43 = vector.broadcast %cst_29 : f32 to vector<8x1xf32>
      %44 = arith.cmpf oeq, %42, %43 : vector<8x1xf32>
      %cst_30 = arith.constant 1.000000e+00 : f32
      %45 = vector.broadcast %cst_30 : f32 to vector<8x1xf32>
      %46 = arith.select %44, %45, %42 : vector<8x1xi1>, vector<8x1xf32>
      %47 = tpu.reciprocal %46 {approx = true} : vector<8x1xf32> -> vector<8x1xf32>
      %48 = arith.mulf %46, %47 : vector<8x1xf32>
      %cst_31 = arith.constant 2.000000e+00 : f32
      %49 = vector.broadcast %cst_31 : f32 to vector<8x1xf32>
      %50 = arith.subf %49, %48 : vector<8x1xf32>
      %51 = arith.mulf %47, %50 : vector<8x1xf32>
      %52 = vector.broadcast %51 : vector<8x1xf32> to vector<8x32xf32>
      %53 = arith.mulf %41, %52 : vector<8x32xf32>
      %c0_32 = arith.constant 0 : index
      %c0_33 = arith.constant 0 : index
      %c0_34 = arith.constant 0 : index
      %54 = vector.load %arg6[%c0_32, %c0_33, %c0_34] : memref<1x8x32xf32, #tpu.memory_space<vmem>>, vector<1x8x32xf32>
      %55 = vector.shape_cast %54 : vector<1x8x32xf32> to vector<8x32xf32>
      %56 = vector.shape_cast %53 : vector<8x32xf32> to vector<1x8x32xf32>
      tpu.vector_store %arg6[%c0_32, %c0_33, %c0_34], %56 {strides = array<i32>} : memref<1x8x32xf32, #tpu.memory_space<vmem>>, vector<1x8x32xf32>,
    } else {
    }
    return
  }
  func.func @transform_0(%arg0: i32, %arg1: i32, %arg2: i32) -> (i32, i32, i32) {
    %c0_i32 = arith.constant 0 : i32
    %c0_i32_0 = arith.constant 0 : i32
    return %arg0, %arg1, %c0_i32 : i32, i32, i32
  }
  func.func @transform_1(%arg0: i32, %arg1: i32, %arg2: i32) -> (i32, i32, i32) {
    %c0_i32 = arith.constant 0 : i32
    %c0_i32_0 = arith.constant 0 : i32
    %c0_i32_1 = arith.constant 0 : i32
    return %arg0, %c0_i32, %c0_i32_0 : i32, i32, i32
  }
  func.func @transform_2(%arg0: i32, %arg1: i32, %arg2: i32) -> (i32, i32, i32) {
    %c0_i32 = arith.constant 0 : i32
    %c0_i32_0 = arith.constant 0 : i32
    %c0_i32_1 = arith.constant 0 : i32
    return %arg0, %c0_i32, %c0_i32_0 : i32, i32, i32
  }
  func.func @transform_3(%arg0: i32, %arg1: i32, %arg2: i32) -> (i32, i32, i32) {
    %c0_i32 = arith.constant 0 : i32
    %c0_i32_0 = arith.constant 0 : i32
    return %arg0, %arg1, %c0_i32 : i32, i32, i32
  }
}

</mosaic_0001>

<bundles_post_ra>
// kernel: tpu_custom_call.1
= control target key start
LH: loop header
LB: loop body
LE: loop exit
PB: predicated region body
PF: predicated region fallthrough
CT: control target
= control target key end

     0   :  { %s1243_s0 = inlined_call_operand.hbm [shape: f32[8,8,32], index: 0, kind: input, shape index: {}]   ;;  %s1244_s1 = inlined_call_operand.hbm [shape: f32[8,8,32], index: 1, kind: input, shape index: {}]   ;;  %s1245_s2 = inlined_call_operand.hbm [shape: f32[8,8,32], index: 2, kind: input, shape index: {}]   ;;  %s1246_s3 = inlined_call_operand.hbm [shape: f32[8,8,32], index: 3, kind: output, shape index: {}]  }
   0x1   :  { %1252 = sst [smem:[#allocation18_spill]] %s1244_s1 }
   0x2   :  { %8 = vsyncpa [#allocation6], 0 }
   0x3   :  { %10 = vsyncpa [#allocation6 + $0x1], 0 }
   0x4   :  { %11 = vsyncpa [#allocation9], 0 }
   0x5   :  { %13 = vsyncpa [#allocation9 + $0x1], 0 }
   0x6   :  { %14 = vsyncpa [#allocation7], 0 }
   0x7   :  { %16 = vsyncpa [#allocation7 + $0x1], 0  ;;  %s969_s12 = smov 0   ;;  %s971_s13 = smov 0  }
   0x8   :  { %s973_s14 = smov 0   ;;  %s975_s15 = smov 0  }
   0x9   :  { %s977_s16 = smov 0   ;;  %s979_s17 = smov 0  }
   0xa LB: > { %1253 = sst [smem:[#allocation15_spill]] %s935_s16  ;;  %s1000_s18 = sadd.s32 4294967295, %s939_s17   ;;  %s939_s17 = sphi %s979_s17, %s22_s17   ;;  %s935_s16 = sphi %s977_s16, %s1273_s16   ;;  %s931_s15 = sphi %s975_s15, %s1272_s15   ;;  %s927_s14 = sphi %s973_s14, %s1276_s14   ;;  %s923_s13 = sphi %s971_s13, %s1275_s13   ;;  %s919_s12 = sphi %s969_s12, %s1274_s12  }
   0xb   : > { %s644_s19 = sadd.s32 4294967294, %s939_s17   ;;  %s41_s20 = sadd.s32 1, %s935_s16 }
   0xc   : > { %s50_s21 = sadd.s32 1, %s927_s14  ;;  %p43_p0 = scmp.ge.s32.totalorder %s41_s20, 8 }
   0xd   : > { %p57_p1 = scmp.ne.s32.totalorder %s927_s14, %s923_s13  ;;  %p58_p2 = scmp.eq.s32.totalorder %s939_s17, 0 }
   0xe   : > { %p63_p3 = scmp.ne.s32.totalorder %s923_s13, %s919_s12  ;;  %s1278_s20 = smov (%p43_p0, %s41_s20), 0 }
   0xf   : > { %1254 = sst [smem:[#allocation16_spill]] %s1278_s20  ;;  %p1012_p4 = por %p58_p2, %p57_p1 }
  0x10   : > { %p64_p5 = scmp.eq.s32.totalorder %s1000_s18, 0  ;;  %s45_s23 = ssub.s32 %s935_s16, %s1278_s20 }
  0x11   : > { %p141_p6 = scmp.eq.s32.totalorder %s1000_s18, 7  ;;  %p48_p7 = scmp.eq.s32.totalorder %s45_s23, 0 }
  0x12   : > { %p1020_p8 = por %p64_p5, %p63_p3  ;;  %p147_p10 = scmp.eq.s32.totalorder %s644_s19, 7 }
  0x13   : > { %p1024_p9 = por %p141_p6, %p57_p1  ;;  %p701_p12 = scmp.lt.s32.totalorder %s939_s17, 8 }
  0x14   : > { %s1256_s24 = scalar_select %p1020_p8, 1, 0 }
  0x15   : > { %s1257_s25 = scalar_select %p1024_p9, 1, 0 }
  0x16   : > { %s1029_s26 = scalar_select %p48_p7, %s927_s14, %s50_s21  }
  0x17   : > { %p1031_p11 = por %p147_p10, %p63_p3  ;;  %s167_s28 = sand.u32 1, %s927_s14  }
  0x18   : > { %1258 = sst [smem:[#allocation17_spill]] %s1029_s26  ;;  %s1039_s29 = sshll.u32 %s167_s28, 3 }
  0x19   : > { %s1259_s27 = scalar_select %p1031_p11, 1, 0 }
  0x1a   : > { %s1042_s30 = sshll.u32 %s935_s16, 7  ;;  %p1046_p13 = pnand %p701_p12, %p1012_p4 }
  0x1b   : > { %s186_s5 = sand.u32 1, %s939_s17   ;;  %s1261_s1 = sld [smem:[#allocation18_spill]] }
  0x1c   : > { %s1260_s4 = scalar_select %p1046_p13, 1, 0 }
  0x1d   : > { %s190_s9 = scalar_lea.vmem [#allocation8], %s1039_s29  ;;  %s1062_s11 = scalar_lea.sflag [#allocation9], %s186_s5 }
  0x1e   : > { %s197_s10 = sshll.u32 %s190_s9, 4  ;;  %p1068_p3 = pneg %p1046_p13  ;;  %s1059_s10 = int_to_ptr.vmem [resolvable:$true] %s197_s10 }
  0x21   : > { %s1055_s8 = scalar_lea.hbm %s1261_s1, %s1042_s30  ;;  %s768_s6 = scalar_lea.hbm %s1261_s1, 1024 }
  0x22   : > { %s763_s19 = scalar_lea.hbm %s1055_s8, 128  ;;  %p769_p6 = scmp.lt.u32.totalorder %s1055_s8, %s1261_s1 }
  0x23   : > { %p764_p2 = scmp.ne.s32.totalorder %s1055_s8, %s763_s19  ;;  %p770_p7 = scmp.lt.u32.totalorder %s768_s6, %s763_s19 }
  0x24   : > { %p772_p12 = scmp.lt.u32.totalorder %s763_s19, %s1055_s8 }
  0x25   : > { %p766_p4 = pnand %p1068_p3, %p764_p2  ;;  %p771_p10 = por %p770_p7, %p769_p6 }
  0x27   : > { %p767_p5 = pneg %p766_p4  ;;  %p773_p0 = por %p772_p12, %p771_p10 }
  0x29   : > { %p774_p1 = pnand %p773_p0, %p767_p5 }
  0x2b   : > { %777 = shalt.err (!%p774_p1)
}
  0x2c   : > { %s778_s5 = scalar_lea.vmem %s1059_s10, 128  ;;  %s941_s22 = smov [#allocation8]  }
  0x2d   : > { %p779_p2 = scmp.ne.s32.totalorder %s1059_s10, %s778_s5  ;;  %s783_s23 = sshll.u32 %s941_s22, 4  ;;  %s784_s23 = int_to_ptr.vmem [resolvable:$false] %s783_s23 }
  0x2e   : > { %s785_s7 = scalar_lea.vmem %s784_s23, 256  ;;  %p786_p9 = scmp.lt.s32.totalorder %s1059_s10, %s784_s23 }
  0x2f   : > { %p781_p4 = pnand %p779_p2, %p1068_p3  ;;  %p787_p8 = scmp.lt.s32.totalorder %s785_s7, %s778_s5 }
  0x31   : > { %p782_p11 = pneg %p781_p4  ;;  %p788_p6 = por %p787_p8, %p786_p9 }
  0x33   : > { %p789_p7 = pnand %p788_p6, %p782_p11 }
  0x35   : > { %792 = shalt.err (!%p789_p7)
}
  0x36   : > { %693 = dma.hbm_to_vmem [thread:$0]  (!%p1046_p13), %s1055_s8, 128, %s1059_s10, %s1062_s11  }
  0x37   : > { %p1263_p0 = scmp.lt.s32.totalorder %s939_s17, 9  ;;  %p1264_p1 = scmp.ge.s32.totalorder %s939_s17, 1 }
  0x38   : > { %s1104_s5 = scalar_lea.hbm %s1243_s0, %s1042_s30  ;;  %s171_s22 = scalar_lea.vmem [#allocation5], %s1039_s29 }
  0x39   : > { %p1096_p5 = pnand %p1264_p1, %p1263_p0  ;;  %s179_s23 = sshll.u32 %s171_s22, 4  ;;  %s1107_s23 = int_to_ptr.vmem [resolvable:$true] %s179_s23 }
  0x3a   : > { %s1113_s7 = scalar_lea.hbm %s1245_s2, %s1042_s30  ;;  %s168_s1 = scalar_lea.sflag [#allocation6], %s167_s28 }
  0x3b   : > { %s1265_s19 = scalar_select %p1096_p5, 1, 0 }
  0x3c   : > { %s793_s20 = scalar_lea.hbm %s1104_s5, 128  ;;  %s798_s16 = scalar_lea.hbm %s1243_s0, 1024 }
  0x3d   : > { %p794_p8 = scmp.ne.s32.totalorder %s1104_s5, %s793_s20  ;;  %p799_p10 = scmp.lt.u32.totalorder %s1104_s5, %s1243_s0 }
  0x3e   : > { %p800_p12 = scmp.lt.u32.totalorder %s798_s16, %s793_s20  ;;  %p802_p4 = scmp.lt.u32.totalorder %s793_s20, %s1104_s5 }
  0x3f   : > { %p796_p9 = pnand %p794_p8, %p1068_p3 }
  0x40   : > { %p801_p2 = por %p800_p12, %p799_p10 }
  0x41   : > { %p797_p11 = pneg %p796_p9 }
  0x42   : > { %p803_p6 = por %p802_p4, %p801_p2 }
  0x44   : > { %p804_p7 = pnand %p803_p6, %p797_p11 }
  0x46   : > { %807 = shalt.err (!%p804_p7)
}
  0x47   : > { %s808_s28 = scalar_lea.vmem %s1107_s23, 128  ;;  %s942_s30 = smov [#allocation5]  }
  0x48   : > { %p809_p0 = scmp.ne.s32.totalorder %s1107_s23, %s808_s28  ;;  %s813_s8 = sshll.u32 %s942_s30, 4  ;;  %s814_s8 = int_to_ptr.vmem [resolvable:$false] %s813_s8 }
  0x49   : > { %s815_s26 = scalar_lea.vmem %s814_s8, 256  ;;  %p816_p9 = scmp.lt.s32.totalorder %s1107_s23, %s814_s8 }
  0x4a   : > { %p811_p1 = pnand %p809_p0, %p1068_p3  ;;  %p817_p5 = scmp.lt.s32.totalorder %s815_s26, %s808_s28 }
  0x4c   : > { %p812_p8 = pneg %p811_p1  ;;  %p818_p10 = por %p817_p5, %p816_p9 }
  0x4e   : > { %p819_p12 = pnand %p818_p10, %p812_p8 }
  0x50   : > { %822 = shalt.err (!%p819_p12)
}
  0x51   : > { %690 = dma.hbm_to_vmem [thread:$0]  (!%p1046_p13), %s1104_s5, 128, %s1107_s23, %s168_s1  }
  0x52   : > { %s208_s16 = scalar_lea.vmem [#allocation10], %s1039_s29  ;;  %s823_s10 = scalar_lea.hbm %s1113_s7, 128 }
  0x53   : > { %s215_s20 = sshll.u32 %s208_s16, 4  ;;  %p824_p11 = scmp.ne.s32.totalorder %s1113_s7, %s823_s10  ;;  %s216_s20 = int_to_ptr.vmem [resolvable:$true] %s215_s20 }
  0x54   : > { %s828_s22 = scalar_lea.hbm %s1245_s2, 1024  ;;  %p829_p4 = scmp.lt.u32.totalorder %s1113_s7, %s1245_s2 }
  0x55   : > { %p826_p5 = pnand %p824_p11, %p1068_p3  ;;  %p830_p6 = scmp.lt.u32.totalorder %s828_s22, %s823_s10 }
  0x56   : > { %p832_p0 = scmp.lt.u32.totalorder %s823_s10, %s1113_s7 }
  0x57   : > { %p827_p2 = pneg %p826_p5  ;;  %p831_p7 = por %p830_p6, %p829_p4 }
  0x59   : > { %p833_p1 = por %p832_p0, %p831_p7 }
  0x5b   : > { %p834_p8 = pnand %p833_p1, %p827_p2 }
  0x5d   : > { %837 = shalt.err (!%p834_p8)
}
  0x5e   : > { %s838_s1 = scalar_lea.vmem %s216_s20, 128  ;;  %s943_s29 = smov [#allocation10]  }
  0x5f   : > { %p839_p9 = scmp.ne.s32.totalorder %s216_s20, %s838_s1  ;;  %s843_s5 = sshll.u32 %s943_s29, 4  ;;  %s844_s5 = int_to_ptr.vmem [resolvable:$false] %s843_s5 }
  0x60   : > { %s845_s23 = scalar_lea.vmem %s844_s5, 256  ;;  %p846_p11 = scmp.lt.s32.totalorder %s216_s20, %s844_s5 }
  0x61   : > { %p841_p10 = pnand %p839_p9, %p1068_p3  ;;  %p847_p5 = scmp.lt.s32.totalorder %s845_s23, %s838_s1 }
  0x63   : > { %p842_p12 = pneg %p841_p10  ;;  %p848_p13 = por %p847_p5, %p846_p11 }
  0x65   : > { %p849_p4 = pnand %p848_p13, %p842_p12 }
  0x67   : > { %852 = shalt.err (!%p849_p4)
}
  0x68   : > { %p1266_p6 = scmp.ne.s32.totalorder %s1260_s4, 0  ;;  %p1267_p2 = scmp.ne.s32.totalorder %s1265_s19, 0 }
  0x69   : > { %s1160_s21 = sand.u32 (!%p1267_p2), 1, %s923_s13   ;;  %p1268_p13 = scmp.ne.s32.totalorder (!%p1267_p2), %s1256_s24, 0 }
  0x6a   : > { %696 = dma.hbm_to_vmem [thread:$0]  (!%p1266_p6), %s1113_s7, 128, %s216_s20, %s1062_s11  }
  0x6b   : > { %224 = sbr.rel (%p1267_p2) target bundleno = 938 (0x3aa), region = 32  ;;  %s1163_s8 = sshll.u32 (!%p1267_p2), %s1160_s21, 3 }
  0x6c   : > { %s227_s26 = scalar_lea.sflag (!%p1267_p2), [#allocation6], %s1160_s21  ;;  %s230_s16 = scalar_lea.vmem (!%p1267_p2), [#allocation5], %s1163_s8 }
  0x72   : > { %906 = dma.done.wait (%p1268_p13), %s227_s26, 128  }
  0x73   : > { %908 = vsyncadd (%p1268_p13), %s227_s26, 4294967168  ;;  %s235_s4 = sand.u32 1, %s1000_s18   ;;  %s239_s19 = scalar_lea.vmem [#allocation8], %s1163_s8 }
  0x74   : > { %s236_s11 = scalar_lea.sflag [#allocation9], %s235_s4 }
  0x75   : > { %910 = dma.done.wait (%p1268_p13), %s236_s11, 256  }
  0x76   : > { %912 = vsyncadd (%p1268_p13), %s236_s11, 4294967040  ;;  %vm288_vm0 = vcmask 261120   ;;  %v944_v0 = vmov 0.0   ;;  %vm945_vm1 = vmmov 0   ;;  %v294_v1 = vld [vmem:[%s239_s19] sm:$0xff]  ;;  %v290_v2 = vld [vmem:[%s230_s16] sm:$0xff] }
  0x77   : > { %669 = vmatprep.subr.mxu0 %v944_v0  ;;  %289 = vst.msk [vmem:[#allocation4] sm:$0xff] %vm288_vm0, %v944_v0  ;;  %671 = vmatprep.mubr.msk.f32.mxu0 %vm945_vm1, %v944_v0  ;;  %v291_v3 = vmul.f32 0.25503486, %v290_v2  ;;  %vm285_vm2 = vcmask 7168   ;;  %v946_v4 = vmov -3e+38  }
  0x78   : > { %674 = vmatprep.subr.mxu1 %v944_v0  ;;  %676 = vmatprep.mubr.msk.f32.mxu1 %vm945_vm1, %v944_v0  ;;  %286 = vst.msk [vmem:[#allocation2] sm:$0xff] %vm285_vm2, %v946_v4  ;;  %287 = vst.msk [vmem:[#allocation3] sm:$0xff] %vm285_vm2, %v944_v0  ;;  %vm375_vm3 = vcmask 64512   ;;  %v947_v8 = vmov 0   ;;  %s248_s18 = scalar_lea.vmem [#allocation10], %s1163_s8  ;;  %s662_s24 = sshll.u32 %s931_s15, 7 }
  0x79   : > { %670 = vmatpush3.xpose.msk.msra.mxu0 %vm288_vm0, %v294_v1  ;;  %755 = vset.pattern.permute.xlu0 %v947_v8  ;;  %v296_v13 = vld [vmem:[%s248_s18] sm:$0xff]  ;;  %s280_s7 = scalar_lea.vmem [#allocation11], %s1163_s8  ;;  %s1194_s9 = scalar_lea.hbm %s1246_s3, %s662_s24 }
  0x7a   : > { %756 = vset.pattern.permute.xlu1 %v947_v8  ;;  %675 = vmatpush3.msra.mxu1 %v296_v13  ;;  %s513_s20 = sshll.u32 %s280_s7, 4  ;;  %s499_s22 = scalar_lea.sflag [#allocation7], %s1160_s21  ;;  %s1196_s20 = int_to_ptr.vmem [resolvable:$true] %s513_s20 }
  0x7b   : > { %s853_s28 = scalar_lea.vmem %s1196_s20, 128  ;;  %p1269_p7 = scmp.ne.s32.totalorder %s1257_s25, 0 }
  0x7c   : > { %672 = vmatmul.mubr.msk.f32.vlgmr.msra.gmra.mrb[0].mxu0 %vm288_vm0, %v291_v3  ;;  %p854_p3 = scmp.ne.s32.totalorder %s1196_s20, %s853_s28  ;;  %s948_s15 = smov [#allocation11]  }
  0x7d   : > { %s857_s30 = sshll.u32 %s948_s15, 4  ;;  %s858_s30 = int_to_ptr.vmem [resolvable:$false] %s857_s30 }
  0x7e   : > { %v397_v29 = vld [vmem:[#allocation4] sm:$0xff]  ;;  %p855_p0 = pnand %p854_p3, %p1269_p7  ;;  %s859_s1 = scalar_lea.vmem %s858_s30, 256 }
  0x7f   : > { %v374_v9 = vld [vmem:[#allocation2] sm:$0xff]  ;;  %v389_v19 = vld [vmem:[#allocation3] sm:$0xff]  ;;  %p860_p8 = scmp.lt.s32.totalorder %s1196_s20, %s858_s30  ;;  %p861_p9 = scmp.lt.s32.totalorder %s859_s1, %s853_s28 }
  0x80   : > { %p856_p1 = pneg %p855_p0 }
  0x81   : > { %p862_p10 = por %p861_p9, %p860_p8 }
  0x83   : > { %p863_p12 = pnand %p862_p10, %p856_p1 }
 0x14f   : > { %v370_v5 = vpop.f32.mrb[0].mxu0 }
 0x150   : > { %v673_v6 = vpop.f32.mrb[1].mxu0  ;;  %v376_v7 = vsel %vm375_vm3, %v370_v5, -inf }
 0x151   : > { %377 = vmax.xlane.f32.xlu0 %v376_v7 }
 0x1de   : > { %v378_v10 = vpop.xlane.xlu0 %377 }
 0x1df   : > { %v379_v11 = vmax.f32 %v374_v9, %v378_v10 }
 0x1e1   : > { %v380_v12 = vsub.f32 %v374_v9, %v379_v11  ;;  %479 = vst.msk [vmem:[#allocation2] sm:$0xff] %vm285_vm2, %v379_v11  ;;  %384 = vperm.xlu0 %755, %v379_v11  }
 0x260   : > { %v385_v14 = vpop.permute.xlu0 %384 }
 0x261   : > { %v387_v15 = vsub.f32 %v370_v5, %v385_v14 }
 0x263   : > { %757 = vpow2.f32 %v387_v15 }
 0x264   : > { %759 = vpow2.f32 %v380_v12 }
 0x26d   : > { %v758_v16 = vpop.eup %757 }
 0x26e   : > { %677 = vmatmul.mubr.msk.f32.vlgmr.msra.gmra.mrb[0].mxu1 %vm375_vm3, %v758_v16  ;;  %v391_v17 = vsel %vm375_vm3, %v758_v16, 0.0  ;;  %v760_v18 = vpop.eup %759 }
 0x26f   : > { %392 = vadd.xlane.f32.xlu1 %v391_v17  ;;  %v390_v20 = vmul.f32 %v760_v18, %v389_v19 }
 0x280   : > { %400 = vperm.xlu1 %756, %v760_v18  }
 0x2fc   : > { %v393_v21 = vpop.xlane.xlu1 %392 }
 0x2fd   : > { %v394_v22 = vadd.f32 %v393_v21, %v390_v20 }
 0x2ff   : > { %396 = vst.msk [vmem:[#allocation3] sm:$0xff] %vm285_vm2, %v394_v22 }
 0x300   : > { %v401_v30 = vpop.permute.xlu1 %400 }
 0x301   : > { %v403_v31 = vmul.f32 %v401_v30, %v397_v29 }
 0x306   : > { %v484_v23 = vld [vmem:[#allocation3] sm:$0xff] }
 0x307   : > { %vm485_vm4 = vcmp.eq.f32.partialorder %v484_v23, 0.0 }
 0x308   : > { %v486_v24 = vsel %vm485_vm4, 1.0, %v484_v23 }
 0x309   : > { %761 = vrcp.f32 %v486_v24 }
 0x313   : > { %v762_v25 = vpop.eup %761 }
 0x314   : > { %v488_v26 = vmul.f32 %v762_v25, %v486_v24 }
 0x316   : > { %v489_v27 = vsub.f32 2.0, %v488_v26 }
 0x318   : > { %v490_v28 = vmul.f32 %v762_v25, %v489_v27 }
 0x31a   : > { %493 = vperm.xlu1 %756, %v490_v28  }
 0x341   : > { %v473_v32 = vpop.f32.mrb[0].mxu1 }
 0x342   : > { %v477_v33 = vadd.f32 %v473_v32, %v403_v31  ;;  %v678_v34 = vpop.f32.mrb[1].mxu1 }
 0x344   : > { %478 = vst.msk [vmem:[#allocation4] sm:$0xff] %vm288_vm0, %v477_v33 }
 0x34b   : > { %v483_v35 = vld [vmem:[#allocation4] sm:$0xff] }
 0x399   : > { %v494_v36 = vpop.permute.xlu1 %493 }
 0x39a   : > { %v496_v37 = vmul.f32 %v494_v36, %v483_v35 }
 0x39c   : > { %497 = vst.msk [vmem:[%s280_s7] sm:$0xff] %vm288_vm0, %v496_v37 }
 0x39d   : > { %866 = shalt.err (!%p863_p12)
}
 0x39e   : > { %s867_s29 = scalar_lea.hbm %s1194_s9, 128  ;;  %s871_s21 = scalar_lea.hbm %s1246_s3, 1024 }
 0x39f   : > { %p868_p11 = scmp.ne.s32.totalorder %s1194_s9, %s867_s29  ;;  %p872_p6 = scmp.lt.u32.totalorder %s1194_s9, %s1246_s3 }
 0x3a0   : > { %p873_p2 = scmp.lt.u32.totalorder %s871_s21, %s867_s29  ;;  %p875_p3 = scmp.lt.u32.totalorder %s867_s29, %s1194_s9 }
 0x3a1   : > { %p869_p5 = pnand %p868_p11, %p1269_p7 }
 0x3a2   : > { %p874_p13 = por %p873_p2, %p872_p6 }
 0x3a3   : > { %p870_p4 = pneg %p869_p5 }
 0x3a4   : > { %p876_p0 = por %p875_p3, %p874_p13 }
 0x3a6   : > { %p877_p1 = pnand %p876_p0, %p870_p4 }
 0x3a8   : > { %880 = shalt.err (!%p877_p1)
}
 0x3a9   : > { %685 = dma.vmem_to_hbm [thread:$0]  (%p1269_p7), %s1196_s20, 128, %s1194_s9, %s499_s22  }
 0x3aa PF: > { %p702_p8 = scmp.ge.s32.totalorder %s939_s17, 2  ;;  %s525_s16 = sand.u32 1, %s919_s12  }
 0x3ab   : > { %p1270_p9 = scmp.ne.s32.totalorder %s1259_s27, 0  ;;  %s526_s4 = scalar_lea.sflag [#allocation7], %s525_s16 }
 0x3ad   : > { %p698_p10 = pnand %p702_p8, %p1270_p9 }
 0x3af   : > { %914 = dma.done.wait (!%p698_p10), %s526_s4, 128  }
 0x3b0   : > { %916 = vsyncadd (!%p698_p10), %s526_s4, 4294967168  ;;  %s22_s17 = sadd.s32 1, %s939_s17   ;;  %s1271_s25 = sld [smem:[#allocation17_spill]] }
 0x3b1   : > { %p19_p12 = scmp.ge.s32.totalorder %s22_s17, 10   ;;  %s1272_s15 = sld [smem:[#allocation15_spill]] }
 0x3b2   : > { %s1273_s16 = sld [smem:[#allocation16_spill]]  ;;  %s1274_s12 = smov %s923_s13 }
 0x3b3   : > { %s1275_s13 = smov %s927_s14  ;;  %21 = sbr.rel (!%p19_p12) target bundleno = 10 (0xa), region = 111 }
 0x3b6   : > { %s1276_s14 = smov %s1271_s25 }
 0x3ba   :  { %531 = vsyncpa [#allocation6], 1 }
 0x3bb   :  { %533 = vsyncpa [#allocation6 + $0x1], 1 }
 0x3bc   :  { %534 = vsyncpa [#allocation9], 1 }
 0x3bd   :  { %536 = vsyncpa [#allocation9 + $0x1], 1 }
 0x3be   :  { %537 = vsyncpa [#allocation7], 1 }
 0x3bf   :  { %539 = vsyncpa [#allocation7 + $0x1], 1 }

</bundles_post_ra>
